<compile_context>
chip_gen: v6e
topology: v6e:2x2x1
jax: 0.10.0
libtpu: 0.0.40
codegen_flags: <defaults>
</compile_context>

<pallas_src>
from functools import partial

import jax
import jax.numpy as jnp
from jax import lax
from jax.experimental import pallas as pl
from jax.experimental.pallas import tpu as pltpu


# ----------------------------------------------------------------------------
# Fused kernel: one batch per grid step.
#   x_ref     : (Np, C)   bf16 activation tile (batch dim squeezed)
#   wqkv_ref  : (C, 3C)   bf16, scale pre-folded into q columns, grid-resident
#   wproj_ref : (C, C)    bf16, grid-resident
#   bproj_ref : (1, C)    f32, grid-resident
#   o_ref     : (Np, C)   output tile (batch dim squeezed), x.dtype
#   qkv_scr   : VMEM (Np, 3C) bf16 QKV activations
#   ctx_scr   : VMEM (Np, C)  bf16 merged per-head attention outputs
# ----------------------------------------------------------------------------
def _fused_attention_kernel(x_ref, wqkv_ref, wproj_ref, bproj_ref, o_ref,
                            qkv_scr, ctx_scr, *, num_heads, head_dim, n_real):
    C = num_heads * head_dim
    n_pad = x_ref.shape[0]

    # QKV projection: bf16 operands on the MXU, f32 accumulation, bf16 scratch.
    # (qkv_bias=False -> no bias, no zero-bias DMA; scale already folded into
    # the q columns of the weight.)
    qkv_scr[...] = jnp.dot(
        x_ref[...], wqkv_ref[...],
        preferred_element_type=jnp.float32).astype(qkv_scr.dtype)

    # Key-padding handling (compile-time static): padded x rows are zero and
    # there is no qkv bias, so padded key rows give score exactly 0; zeroing
    # their softmax weights (instead of -inf masking) is sufficient because
    # softmax is shift-invariant and the row max only needs to be an upper
    # bound.  Hoisted out of the head loop (same mask for every head).
    need_mask = n_real != n_pad
    if need_mask:
        kv_valid = lax.broadcasted_iota(jnp.int32, (n_pad, n_pad), 1) < n_real

    # Per-head scaled-dot-product attention.  Column layout of qkv_scr matches
    # the PyTorch reshape(B, N, 3, H, D): q -> [h*D, (h+1)*D),
    # k -> [C + h*D, ...), v -> [2C + h*D, ...).  Static lane slices.
    for h in range(num_heads):
        lo = h * head_dim
        q = qkv_scr[:, lo:lo + head_dim]                       # bf16 (Np, D)
        k = qkv_scr[:, C + lo:C + lo + head_dim]               # bf16 (Np, D)
        v = qkv_scr[:, 2 * C + lo:2 * C + lo + head_dim]       # bf16 (Np, D)

        # q @ k^T without materializing a transpose of k; f32 accumulation.
        s = lax.dot_general(q, k, (((1,), (1,)), ((), ())),
                            preferred_element_type=jnp.float32)   # f32 (Np, Np)

        # Softmax in f32 (safe on v5e: no bf16 VPU/EUP there).
        m = jnp.max(s, axis=-1, keepdims=True)
        p = jnp.exp(s - m)
        if need_mask:
            p = jnp.where(kv_valid, p, 0.0)
        denom = jnp.sum(p, axis=-1, keepdims=True)                 # f32 (Np, 1)

        # Cast p to bf16 so the second attention GEMM stays on the native
        # bf16 MXU path; keep f32 accumulation.
        ctx = jnp.dot(p.astype(v.dtype), v,
                      preferred_element_type=jnp.float32)          # f32 (Np, D)

        # Deferred normalization: (Np, D) multiply + EUP reciprocal instead of
        # dividing the (Np, Np) score matrix.
        ctx_scr[:, lo:lo + head_dim] = (
            ctx * pl.reciprocal(denom, approx=True)).astype(ctx_scr.dtype)

    # Output projection with bias; bf16 operands, f32 accumulate, lane-dense
    # (C-wide) store to the HBM block.
    out = jnp.dot(ctx_scr[...], wproj_ref[...],
                  preferred_element_type=jnp.float32)
    o_ref[...] = (out + bproj_ref[...]).astype(o_ref.dtype)


# ----------------------------------------------------------------------------
# Module-equivalent forward pass (Attention.forward, attn_mask=None, p=0).
# ----------------------------------------------------------------------------
def attention_forward(x, w_qkv, w_proj, b_proj, num_heads):
    B, N, C = x.shape
    assert C % num_heads == 0
    head_dim = C // num_heads
    scale = head_dim ** (-0.5)  # F.scaled_dot_product_attention default scale

    # Pad the sequence to a sublane multiple so every in-kernel op is
    # unmasked; padded key rows are masked out of the softmax in-kernel.
    n_pad = ((N + 7) // 8) * 8
    x_p = x if n_pad == N else jnp.pad(x, ((0, 0), (0, n_pad - N), (0, 0)))

    # Weight prep (in a real model do this once at parameter-load time):
    #   * fold the softmax scale into the q columns of W_qkv,
    #   * cast matmul operands to bf16 (f32 accumulation stays in-kernel),
    #   * bias stays f32 (added to the f32 accumulator).
    w_qkv_bf = w_qkv.at[:, :C].multiply(scale).astype(jnp.bfloat16)
    w_proj_bf = w_proj.astype(jnp.bfloat16)
    b_proj_f32 = b_proj.astype(jnp.float32).reshape(1, C)
    x_bf = x_p.astype(jnp.bfloat16)

    # VMEM budget from the actual footprint (double-buffered HBM blocks +
    # resident weights + scratch), with 2x headroom; floor at the default
    # scoped limit, cap below v7x's 64 MiB physical minus headroom.
    out_bytes = jnp.dtype(x.dtype).itemsize
    footprint = (
        2 * (n_pad * C * 2)                    # x block (bf16), double-buffered
        + 2 * (n_pad * C * out_bytes)          # out block, double-buffered
        + 2 * ((C * 3 * C + C * C) * 2)        # weights (bf16), double-buffered
        + 2 * (C * 4)                          # bias (f32), double-buffered
        + n_pad * 3 * C * 2                    # qkv scratch (bf16)
        + n_pad * C * 2                        # ctx scratch (bf16)
    )
    vmem_limit = int(min(max(2 * footprint, 32 * 1024 * 1024),
                         56 * 1024 * 1024))

    kernel = partial(_fused_attention_kernel,
                     num_heads=num_heads, head_dim=head_dim, n_real=N)

    out_p = pl.pallas_call(
        kernel,
        out_shape=jax.ShapeDtypeStruct((B, n_pad, C), x.dtype),
        grid=(B,),
        in_specs=[
            # Activations: one batch tile per grid step, batch dim squeezed.
            pl.BlockSpec((None, n_pad, C), lambda b: (b, 0, 0)),
            # Weights / bias: constant index_map -> fetched once, VMEM-resident.
            pl.BlockSpec((C, 3 * C), lambda b: (0, 0)),
            pl.BlockSpec((C, C), lambda b: (0, 0)),
            pl.BlockSpec((1, C), lambda b: (0, 0)),
        ],
        out_specs=pl.BlockSpec((None, n_pad, C), lambda b: (b, 0, 0)),
        scratch_shapes=[
            pltpu.VMEM((n_pad, 3 * C), jnp.bfloat16),   # qkv activations
            pltpu.VMEM((n_pad, C), jnp.bfloat16),       # merged head outputs
        ],
        compiler_params=pltpu.CompilerParams(
            dimension_semantics=("parallel",),   # batch shards across TCs
            vmem_limit_bytes=vmem_limit,
        ),
    )(x_bf, w_qkv_bf, w_proj_bf, b_proj_f32)

    return out_p if n_pad == N else out_p[:, :N, :]


# ----------------------------------------------------------------------------
# Pure-JAX f32 reference for a sanity check.
# ----------------------------------------------------------------------------
def attention_ref(x, w_qkv, w_proj, b_proj, num_heads):
    B, N, C = x.shape
    head_dim = C // num_heads
    scale = head_dim ** (-0.5)
    qkv = x.reshape(B * N, C) @ w_qkv
    qkv = qkv.reshape(B, N, 3, num_heads, head_dim).transpose(2, 0, 3, 1, 4)
    q, k, v = qkv[0], qkv[1], qkv[2]
    s = jnp.einsum("bhqd,bhkd->bhqk", q, k) * scale
    a = jax.nn.softmax(s, axis=-1)
    o = jnp.einsum("bhqk,bhkd->bhqd", a, v)
    o = o.transpose(0, 2, 1, 3).reshape(B * N, C)
    return (o @ w_proj + b_proj).reshape(B, N, C)


if __name__ == "__main__":
    key = jax.random.PRNGKey(0)

    def run_case(B, N, C, num_heads, case_key):
        k_x, k_qkv, k_proj, k_bias = jax.random.split(case_key, 4)
        x = jax.random.normal(k_x, (B, N, C), dtype=jnp.float32)
        w_qkv = 0.02 * jax.random.normal(k_qkv, (C, 3 * C), dtype=jnp.float32)
        w_proj = 0.02 * jax.random.normal(k_proj, (C, C), dtype=jnp.float32)
        b_proj = 0.02 * jax.random.normal(k_bias, (C,), dtype=jnp.float32)

        out = attention_forward(x, w_qkv, w_proj, b_proj, num_heads)
        out = jax.block_until_ready(out)
        ref = attention_ref(x, w_qkv, w_proj, b_proj, num_heads)

        assert out.shape == (B, N, C), (out.shape, (B, N, C))
        # bf16 MXU operands + approximate reciprocal => relaxed tolerance vs
        # the f32 reference (precision trade documented in the review).
        assert jnp.allclose(out, ref, atol=1e-2, rtol=1e-2), (
            "mismatch vs reference: max abs err "
            f"{float(jnp.max(jnp.abs(out - ref)))}")

    k0, k1 = jax.random.split(key)
    run_case(2, 8, 32, 8, k0)    # aligned sequence length (no padding path)
    run_case(2, 12, 32, 4, k1)   # unaligned N -> pad-to-16 + key-mask path

    print("KERNEL_OK")
</pallas_src>

<mosaic_0001>
module attributes {stable_mosaic.version = 11 : i64} {
  func.func @_fused_attention_kernel(%arg0: i32, %arg1: memref<1x8x32xbf16, #tpu.memory_space<vmem>>, %arg2: memref<32x96xbf16, #tpu.memory_space<vmem>>, %arg3: memref<32x32xbf16, #tpu.memory_space<vmem>>, %arg4: memref<1x32xf32, #tpu.memory_space<vmem>>, %arg5: memref<1x8x32xf32, #tpu.memory_space<vmem>>, %arg6: memref<8x96xbf16, #tpu.memory_space<vmem>>, %arg7: memref<8x32xbf16, #tpu.memory_space<vmem>>) attributes {dimension_semantics = [#tpu.dimension_semantics<parallel>], iteration_bounds = array<i64: 2>, scalar_prefetch = 0 : i64, scratch_operands = 2 : i64, tpu.core_type = #tpu.core_type<tc>, window_params = [{transform_indices = @transform_0, window_bounds = array<i64: 1, 8, 32>}, {pipeline_mode = #tpu.pipeline_mode<synchronous>, transform_indices = @transform_1, window_bounds = array<i64: 32, 96>}, {pipeline_mode = #tpu.pipeline_mode<synchronous>, transform_indices = @transform_2, window_bounds = array<i64: 32, 32>}, {pipeline_mode = #tpu.pipeline_mode<synchronous>, transform_indices = @transform_3, window_bounds = array<i64: 1, 32>}, {transform_indices = @transform_4, window_bounds = array<i64: 1, 8, 32>}]} {
    %c0 = arith.constant 0 : index
    %c0_0 = arith.constant 0 : index
    %c0_1 = arith.constant 0 : index
    %0 = vector.load %arg1[%c0, %c0_0, %c0_1] : memref<1x8x32xbf16, #tpu.memory_space<vmem>>, vector<1x8x32xbf16>
    %1 = vector.shape_cast %0 : vector<1x8x32xbf16> to vector<8x32xbf16>
    %c0_2 = arith.constant 0 : index
    %c0_3 = arith.constant 0 : index
    %2 = vector.load %arg2[%c0_2, %c0_3] : memref<32x96xbf16, #tpu.memory_space<vmem>>, vector<32x96xbf16>
    %cst = arith.constant dense<0.000000e+00> : vector<8x96xf32>
    %3 = tpu.matmul %1, %2, %cst {dimension_numbers = #tpu.dot_dimension_numbers<[1], [0], [0], [1], [0, 0, 1, 1], [], []>} : vector<8x32xbf16>, vector<32x96xbf16>, vector<8x96xf32> -> vector<8x96xf32>
    %4 = arith.truncf %3 : vector<8x96xf32> to vector<8x96xbf16>
    %c0_4 = arith.constant 0 : index
    %c0_5 = arith.constant 0 : index
    %5 = vector.load %arg6[%c0_4, %c0_5] : memref<8x96xbf16, #tpu.memory_space<vmem>>, vector<8x96xbf16>
    tpu.vector_store %arg6[%c0_4, %c0_5], %4 {strides = array<i32>} : memref<8x96xbf16, #tpu.memory_space<vmem>>, vector<8x96xbf16>,
    %c0_6 = arith.constant 0 : index
    %c0_7 = arith.constant 0 : index
    %6 = vector.load %arg6[%c0_6, %c0_7] : memref<8x96xbf16, #tpu.memory_space<vmem>>, vector<8x4xbf16>
    %c0_8 = arith.constant 0 : index
    %c32 = arith.constant 32 : index
    %7 = vector.load %arg6[%c0_8, %c32] : memref<8x96xbf16, #tpu.memory_space<vmem>>, vector<8x4xbf16>
    %c0_9 = arith.constant 0 : index
    %c64 = arith.constant 64 : index
    %8 = vector.load %arg6[%c0_9, %c64] : memref<8x96xbf16, #tpu.memory_space<vmem>>, vector<8x4xbf16>
    %cst_10 = arith.constant dense<0.000000e+00> : vector<8x8xf32>
    %9 = tpu.matmul %6, %7, %cst_10 {dimension_numbers = #tpu.dot_dimension_numbers<[1], [1], [0], [0], [0, 0, 1, 0], [], []>} : vector<8x4xbf16>, vector<8x4xbf16>, vector<8x8xf32> -> vector<8x8xf32>
    %cst_11 = arith.constant dense<0xFF800000> : vector<8xf32>
    %10 = vector.multi_reduction <maximumf>, %9, %cst_11 [1] : vector<8x8xf32> to vector<8xf32>
    %11 = vector.shape_cast %10 : vector<8xf32> to vector<8x1xf32>
    %12 = vector.broadcast %11 : vector<8x1xf32> to vector<8x8xf32>
    %13 = arith.subf %9, %12 : vector<8x8xf32>
    %14 = math.exp %13 : vector<8x8xf32>
    %cst_12 = arith.constant dense<0.000000e+00> : vector<8xf32>
    %15 = vector.multi_reduction <add>, %14, %cst_12 [1] : vector<8x8xf32> to vector<8xf32>
    %16 = vector.shape_cast %15 : vector<8xf32> to vector<8x1xf32>
    %17 = arith.truncf %14 : vector<8x8xf32> to vector<8x8xbf16>
    %cst_13 = arith.constant dense<0.000000e+00> : vector<8x4xf32>
    %18 = tpu.matmul %17, %8, %cst_13 {dimension_numbers = #tpu.dot_dimension_numbers<[1], [0], [0], [1], [0, 0, 1, 1], [], []>} : vector<8x8xbf16>, vector<8x4xbf16>, vector<8x4xf32> -> vector<8x4xf32>
    %19 = tpu.reciprocal %16 {approx = true} : vector<8x1xf32> -> vector<8x1xf32>
    %20 = vector.broadcast %19 : vector<8x1xf32> to vector<8x4xf32>
    %21 = arith.mulf %18, %20 : vector<8x4xf32>
    %22 = arith.truncf %21 : vector<8x4xf32> to vector<8x4xbf16>
    %c0_14 = arith.constant 0 : index
    %c0_15 = arith.constant 0 : index
    %23 = vector.load %arg7[%c0_14, %c0_15] : memref<8x32xbf16, #tpu.memory_space<vmem>>, vector<8x4xbf16>
    tpu.vector_store %arg7[%c0_14, %c0_15], %22 {strides = array<i32>} : memref<8x32xbf16, #tpu.memory_space<vmem>>, vector<8x4xbf16>,
    %c0_16 = arith.constant 0 : index
    %c4 = arith.constant 4 : index
    %24 = vector.load %arg6[%c0_16, %c4] : memref<8x96xbf16, #tpu.memory_space<vmem>>, vector<8x4xbf16>
    %c0_17 = arith.constant 0 : index
    %c36 = arith.constant 36 : index
    %25 = vector.load %arg6[%c0_17, %c36] : memref<8x96xbf16, #tpu.memory_space<vmem>>, vector<8x4xbf16>
    %c0_18 = arith.constant 0 : index
    %c68 = arith.constant 68 : index
    %26 = vector.load %arg6[%c0_18, %c68] : memref<8x96xbf16, #tpu.memory_space<vmem>>, vector<8x4xbf16>
    %cst_19 = arith.constant dense<0.000000e+00> : vector<8x8xf32>
    %27 = tpu.matmul %24, %25, %cst_19 {dimension_numbers = #tpu.dot_dimension_numbers<[1], [1], [0], [0], [0, 0, 1, 0], [], []>} : vector<8x4xbf16>, vector<8x4xbf16>, vector<8x8xf32> -> vector<8x8xf32>
    %cst_20 = arith.constant dense<0xFF800000> : vector<8xf32>
    %28 = vector.multi_reduction <maximumf>, %27, %cst_20 [1] : vector<8x8xf32> to vector<8xf32>
    %29 = vector.shape_cast %28 : vector<8xf32> to vector<8x1xf32>
    %30 = vector.broadcast %29 : vector<8x1xf32> to vector<8x8xf32>
    %31 = arith.subf %27, %30 : vector<8x8xf32>
    %32 = math.exp %31 : vector<8x8xf32>
    %cst_21 = arith.constant dense<0.000000e+00> : vector<8xf32>
    %33 = vector.multi_reduction <add>, %32, %cst_21 [1] : vector<8x8xf32> to vector<8xf32>
    %34 = vector.shape_cast %33 : vector<8xf32> to vector<8x1xf32>
    %35 = arith.truncf %32 : vector<8x8xf32> to vector<8x8xbf16>
    %cst_22 = arith.constant dense<0.000000e+00> : vector<8x4xf32>
    %36 = tpu.matmul %35, %26, %cst_22 {dimension_numbers = #tpu.dot_dimension_numbers<[1], [0], [0], [1], [0, 0, 1, 1], [], []>} : vector<8x8xbf16>, vector<8x4xbf16>, vector<8x4xf32> -> vector<8x4xf32>
    %37 = tpu.reciprocal %34 {approx = true} : vector<8x1xf32> -> vector<8x1xf32>
    %38 = vector.broadcast %37 : vector<8x1xf32> to vector<8x4xf32>
    %39 = arith.mulf %36, %38 : vector<8x4xf32>
    %40 = arith.truncf %39 : vector<8x4xf32> to vector<8x4xbf16>
    %c0_23 = arith.constant 0 : index
    %c4_24 = arith.constant 4 : index
    %41 = vector.load %arg7[%c0_23, %c4_24] : memref<8x32xbf16, #tpu.memory_space<vmem>>, vector<8x4xbf16>
    tpu.vector_store %arg7[%c0_23, %c4_24], %40 {strides = array<i32>} : memref<8x32xbf16, #tpu.memory_space<vmem>>, vector<8x4xbf16>,
    %c0_25 = arith.constant 0 : index
    %c8 = arith.constant 8 : index
    %42 = vector.load %arg6[%c0_25, %c8] : memref<8x96xbf16, #tpu.memory_space<vmem>>, vector<8x4xbf16>
    %c0_26 = arith.constant 0 : index
    %c40 = arith.constant 40 : index
    %43 = vector.load %arg6[%c0_26, %c40] : memref<8x96xbf16, #tpu.memory_space<vmem>>, vector<8x4xbf16>
    %c0_27 = arith.constant 0 : index
    %c72 = arith.constant 72 : index
    %44 = vector.load %arg6[%c0_27, %c72] : memref<8x96xbf16, #tpu.memory_space<vmem>>, vector<8x4xbf16>
    %cst_28 = arith.constant dense<0.000000e+00> : vector<8x8xf32>
    %45 = tpu.matmul %42, %43, %cst_28 {dimension_numbers = #tpu.dot_dimension_numbers<[1], [1], [0], [0], [0, 0, 1, 0], [], []>} : vector<8x4xbf16>, vector<8x4xbf16>, vector<8x8xf32> -> vector<8x8xf32>
    %cst_29 = arith.constant dense<0xFF800000> : vector<8xf32>
    %46 = vector.multi_reduction <maximumf>, %45, %cst_29 [1] : vector<8x8xf32> to vector<8xf32>
    %47 = vector.shape_cast %46 : vector<8xf32> to vector<8x1xf32>
    %48 = vector.broadcast %47 : vector<8x1xf32> to vector<8x8xf32>
    %49 = arith.subf %45, %48 : vector<8x8xf32>
    %50 = math.exp %49 : vector<8x8xf32>
    %cst_30 = arith.constant dense<0.000000e+00> : vector<8xf32>
    %51 = vector.multi_reduction <add>, %50, %cst_30 [1] : vector<8x8xf32> to vector<8xf32>
    %52 = vector.shape_cast %51 : vector<8xf32> to vector<8x1xf32>
    %53 = arith.truncf %50 : vector<8x8xf32> to vector<8x8xbf16>
    %cst_31 = arith.constant dense<0.000000e+00> : vector<8x4xf32>
    %54 = tpu.matmul %53, %44, %cst_31 {dimension_numbers = #tpu.dot_dimension_numbers<[1], [0], [0], [1], [0, 0, 1, 1], [], []>} : vector<8x8xbf16>, vector<8x4xbf16>, vector<8x4xf32> -> vector<8x4xf32>
    %55 = tpu.reciprocal %52 {approx = true} : vector<8x1xf32> -> vector<8x1xf32>
    %56 = vector.broadcast %55 : vector<8x1xf32> to vector<8x4xf32>
    %57 = arith.mulf %54, %56 : vector<8x4xf32>
    %58 = arith.truncf %57 : vector<8x4xf32> to vector<8x4xbf16>
    %c0_32 = arith.constant 0 : index
    %c8_33 = arith.constant 8 : index
    %59 = vector.load %arg7[%c0_32, %c8_33] : memref<8x32xbf16, #tpu.memory_space<vmem>>, vector<8x4xbf16>
    tpu.vector_store %arg7[%c0_32, %c8_33], %58 {strides = array<i32>} : memref<8x32xbf16, #tpu.memory_space<vmem>>, vector<8x4xbf16>,
    %c0_34 = arith.constant 0 : index
    %c12 = arith.constant 12 : index
    %60 = vector.load %arg6[%c0_34, %c12] : memref<8x96xbf16, #tpu.memory_space<vmem>>, vector<8x4xbf16>
    %c0_35 = arith.constant 0 : index
    %c44 = arith.constant 44 : index
    %61 = vector.load %arg6[%c0_35, %c44] : memref<8x96xbf16, #tpu.memory_space<vmem>>, vector<8x4xbf16>
    %c0_36 = arith.constant 0 : index
    %c76 = arith.constant 76 : index
    %62 = vector.load %arg6[%c0_36, %c76] : memref<8x96xbf16, #tpu.memory_space<vmem>>, vector<8x4xbf16>
    %cst_37 = arith.constant dense<0.000000e+00> : vector<8x8xf32>
    %63 = tpu.matmul %60, %61, %cst_37 {dimension_numbers = #tpu.dot_dimension_numbers<[1], [1], [0], [0], [0, 0, 1, 0], [], []>} : vector<8x4xbf16>, vector<8x4xbf16>, vector<8x8xf32> -> vector<8x8xf32>
    %cst_38 = arith.constant dense<0xFF800000> : vector<8xf32>
    %64 = vector.multi_reduction <maximumf>, %63, %cst_38 [1] : vector<8x8xf32> to vector<8xf32>
    %65 = vector.shape_cast %64 : vector<8xf32> to vector<8x1xf32>
    %66 = vector.broadcast %65 : vector<8x1xf32> to vector<8x8xf32>
    %67 = arith.subf %63, %66 : vector<8x8xf32>
    %68 = math.exp %67 : vector<8x8xf32>
    %cst_39 = arith.constant dense<0.000000e+00> : vector<8xf32>
    %69 = vector.multi_reduction <add>, %68, %cst_39 [1] : vector<8x8xf32> to vector<8xf32>
    %70 = vector.shape_cast %69 : vector<8xf32> to vector<8x1xf32>
    %71 = arith.truncf %68 : vector<8x8xf32> to vector<8x8xbf16>
    %cst_40 = arith.constant dense<0.000000e+00> : vector<8x4xf32>
    %72 = tpu.matmul %71, %62, %cst_40 {dimension_numbers = #tpu.dot_dimension_numbers<[1], [0], [0], [1], [0, 0, 1, 1], [], []>} : vector<8x8xbf16>, vector<8x4xbf16>, vector<8x4xf32> -> vector<8x4xf32>
    %73 = tpu.reciprocal %70 {approx = true} : vector<8x1xf32> -> vector<8x1xf32>
    %74 = vector.broadcast %73 : vector<8x1xf32> to vector<8x4xf32>
    %75 = arith.mulf %72, %74 : vector<8x4xf32>
    %76 = arith.truncf %75 : vector<8x4xf32> to vector<8x4xbf16>
    %c0_41 = arith.constant 0 : index
    %c12_42 = arith.constant 12 : index
    %77 = vector.load %arg7[%c0_41, %c12_42] : memref<8x32xbf16, #tpu.memory_space<vmem>>, vector<8x4xbf16>
    tpu.vector_store %arg7[%c0_41, %c12_42], %76 {strides = array<i32>} : memref<8x32xbf16, #tpu.memory_space<vmem>>, vector<8x4xbf16>,
    %c0_43 = arith.constant 0 : index
    %c16 = arith.constant 16 : index
    %78 = vector.load %arg6[%c0_43, %c16] : memref<8x96xbf16, #tpu.memory_space<vmem>>, vector<8x4xbf16>
    %c0_44 = arith.constant 0 : index
    %c48 = arith.constant 48 : index
    %79 = vector.load %arg6[%c0_44, %c48] : memref<8x96xbf16, #tpu.memory_space<vmem>>, vector<8x4xbf16>
    %c0_45 = arith.constant 0 : index
    %c80 = arith.constant 80 : index
    %80 = vector.load %arg6[%c0_45, %c80] : memref<8x96xbf16, #tpu.memory_space<vmem>>, vector<8x4xbf16>
    %cst_46 = arith.constant dense<0.000000e+00> : vector<8x8xf32>
    %81 = tpu.matmul %78, %79, %cst_46 {dimension_numbers = #tpu.dot_dimension_numbers<[1], [1], [0], [0], [0, 0, 1, 0], [], []>} : vector<8x4xbf16>, vector<8x4xbf16>, vector<8x8xf32> -> vector<8x8xf32>
    %cst_47 = arith.constant dense<0xFF800000> : vector<8xf32>
    %82 = vector.multi_reduction <maximumf>, %81, %cst_47 [1] : vector<8x8xf32> to vector<8xf32>
    %83 = vector.shape_cast %82 : vector<8xf32> to vector<8x1xf32>
    %84 = vector.broadcast %83 : vector<8x1xf32> to vector<8x8xf32>
    %85 = arith.subf %81, %84 : vector<8x8xf32>
    %86 = math.exp %85 : vector<8x8xf32>
    %cst_48 = arith.constant dense<0.000000e+00> : vector<8xf32>
    %87 = vector.multi_reduction <add>, %86, %cst_48 [1] : vector<8x8xf32> to vector<8xf32>
    %88 = vector.shape_cast %87 : vector<8xf32> to vector<8x1xf32>
    %89 = arith.truncf %86 : vector<8x8xf32> to vector<8x8xbf16>
    %cst_49 = arith.constant dense<0.000000e+00> : vector<8x4xf32>
    %90 = tpu.matmul %89, %80, %cst_49 {dimension_numbers = #tpu.dot_dimension_numbers<[1], [0], [0], [1], [0, 0, 1, 1], [], []>} : vector<8x8xbf16>, vector<8x4xbf16>, vector<8x4xf32> -> vector<8x4xf32>
    %91 = tpu.reciprocal %88 {approx = true} : vector<8x1xf32> -> vector<8x1xf32>
    %92 = vector.broadcast %91 : vector<8x1xf32> to vector<8x4xf32>
    %93 = arith.mulf %90, %92 : vector<8x4xf32>
    %94 = arith.truncf %93 : vector<8x4xf32> to vector<8x4xbf16>
    %c0_50 = arith.constant 0 : index
    %c16_51 = arith.constant 16 : index
    %95 = vector.load %arg7[%c0_50, %c16_51] : memref<8x32xbf16, #tpu.memory_space<vmem>>, vector<8x4xbf16>
    tpu.vector_store %arg7[%c0_50, %c16_51], %94 {strides = array<i32>} : memref<8x32xbf16, #tpu.memory_space<vmem>>, vector<8x4xbf16>,
    %c0_52 = arith.constant 0 : index
    %c20 = arith.constant 20 : index
    %96 = vector.load %arg6[%c0_52, %c20] : memref<8x96xbf16, #tpu.memory_space<vmem>>, vector<8x4xbf16>
    %c0_53 = arith.constant 0 : index
    %c52 = arith.constant 52 : index
    %97 = vector.load %arg6[%c0_53, %c52] : memref<8x96xbf16, #tpu.memory_space<vmem>>, vector<8x4xbf16>
    %c0_54 = arith.constant 0 : index
    %c84 = arith.constant 84 : index
    %98 = vector.load %arg6[%c0_54, %c84] : memref<8x96xbf16, #tpu.memory_space<vmem>>, vector<8x4xbf16>
    %cst_55 = arith.constant dense<0.000000e+00> : vector<8x8xf32>
    %99 = tpu.matmul %96, %97, %cst_55 {dimension_numbers = #tpu.dot_dimension_numbers<[1], [1], [0], [0], [0, 0, 1, 0], [], []>} : vector<8x4xbf16>, vector<8x4xbf16>, vector<8x8xf32> -> vector<8x8xf32>
    %cst_56 = arith.constant dense<0xFF800000> : vector<8xf32>
    %100 = vector.multi_reduction <maximumf>, %99, %cst_56 [1] : vector<8x8xf32> to vector<8xf32>
    %101 = vector.shape_cast %100 : vector<8xf32> to vector<8x1xf32>
    %102 = vector.broadcast %101 : vector<8x1xf32> to vector<8x8xf32>
    %103 = arith.subf %99, %102 : vector<8x8xf32>
    %104 = math.exp %103 : vector<8x8xf32>
    %cst_57 = arith.constant dense<0.000000e+00> : vector<8xf32>
    %105 = vector.multi_reduction <add>, %104, %cst_57 [1] : vector<8x8xf32> to vector<8xf32>
    %106 = vector.shape_cast %105 : vector<8xf32> to vector<8x1xf32>
    %107 = arith.truncf %104 : vector<8x8xf32> to vector<8x8xbf16>
    %cst_58 = arith.constant dense<0.000000e+00> : vector<8x4xf32>
    %108 = tpu.matmul %107, %98, %cst_58 {dimension_numbers = #tpu.dot_dimension_numbers<[1], [0], [0], [1], [0, 0, 1, 1], [], []>} : vector<8x8xbf16>, vector<8x4xbf16>, vector<8x4xf32> -> vector<8x4xf32>
    %109 = tpu.reciprocal %106 {approx = true} : vector<8x1xf32> -> vector<8x1xf32>
    %110 = vector.broadcast %109 : vector<8x1xf32> to vector<8x4xf32>
    %111 = arith.mulf %108, %110 : vector<8x4xf32>
    %112 = arith.truncf %111 : vector<8x4xf32> to vector<8x4xbf16>
    %c0_59 = arith.constant 0 : index
    %c20_60 = arith.constant 20 : index
    %113 = vector.load %arg7[%c0_59, %c20_60] : memref<8x32xbf16, #tpu.memory_space<vmem>>, vector<8x4xbf16>
    tpu.vector_store %arg7[%c0_59, %c20_60], %112 {strides = array<i32>} : memref<8x32xbf16, #tpu.memory_space<vmem>>, vector<8x4xbf16>,
    %c0_61 = arith.constant 0 : index
    %c24 = arith.constant 24 : index
    %114 = vector.load %arg6[%c0_61, %c24] : memref<8x96xbf16, #tpu.memory_space<vmem>>, vector<8x4xbf16>
    %c0_62 = arith.constant 0 : index
    %c56 = arith.constant 56 : index
    %115 = vector.load %arg6[%c0_62, %c56] : memref<8x96xbf16, #tpu.memory_space<vmem>>, vector<8x4xbf16>
    %c0_63 = arith.constant 0 : index
    %c88 = arith.constant 88 : index
    %116 = vector.load %arg6[%c0_63, %c88] : memref<8x96xbf16, #tpu.memory_space<vmem>>, vector<8x4xbf16>
    %cst_64 = arith.constant dense<0.000000e+00> : vector<8x8xf32>
    %117 = tpu.matmul %114, %115, %cst_64 {dimension_numbers = #tpu.dot_dimension_numbers<[1], [1], [0], [0], [0, 0, 1, 0], [], []>} : vector<8x4xbf16>, vector<8x4xbf16>, vector<8x8xf32> -> vector<8x8xf32>
    %cst_65 = arith.constant dense<0xFF800000> : vector<8xf32>
    %118 = vector.multi_reduction <maximumf>, %117, %cst_65 [1] : vector<8x8xf32> to vector<8xf32>
    %119 = vector.shape_cast %118 : vector<8xf32> to vector<8x1xf32>
    %120 = vector.broadcast %119 : vector<8x1xf32> to vector<8x8xf32>
    %121 = arith.subf %117, %120 : vector<8x8xf32>
    %122 = math.exp %121 : vector<8x8xf32>
    %cst_66 = arith.constant dense<0.000000e+00> : vector<8xf32>
    %123 = vector.multi_reduction <add>, %122, %cst_66 [1] : vector<8x8xf32> to vector<8xf32>
    %124 = vector.shape_cast %123 : vector<8xf32> to vector<8x1xf32>
    %125 = arith.truncf %122 : vector<8x8xf32> to vector<8x8xbf16>
    %cst_67 = arith.constant dense<0.000000e+00> : vector<8x4xf32>
    %126 = tpu.matmul %125, %116, %cst_67 {dimension_numbers = #tpu.dot_dimension_numbers<[1], [0], [0], [1], [0, 0, 1, 1], [], []>} : vector<8x8xbf16>, vector<8x4xbf16>, vector<8x4xf32> -> vector<8x4xf32>
    %127 = tpu.reciprocal %124 {approx = true} : vector<8x1xf32> -> vector<8x1xf32>
    %128 = vector.broadcast %127 : vector<8x1xf32> to vector<8x4xf32>
    %129 = arith.mulf %126, %128 : vector<8x4xf32>
    %130 = arith.truncf %129 : vector<8x4xf32> to vector<8x4xbf16>
    %c0_68 = arith.constant 0 : index
    %c24_69 = arith.constant 24 : index
    %131 = vector.load %arg7[%c0_68, %c24_69] : memref<8x32xbf16, #tpu.memory_space<vmem>>, vector<8x4xbf16>
    tpu.vector_store %arg7[%c0_68, %c24_69], %130 {strides = array<i32>} : memref<8x32xbf16, #tpu.memory_space<vmem>>, vector<8x4xbf16>,
    %c0_70 = arith.constant 0 : index
    %c28 = arith.constant 28 : index
    %132 = vector.load %arg6[%c0_70, %c28] : memref<8x96xbf16, #tpu.memory_space<vmem>>, vector<8x4xbf16>
    %c0_71 = arith.constant 0 : index
    %c60 = arith.constant 60 : index
    %133 = vector.load %arg6[%c0_71, %c60] : memref<8x96xbf16, #tpu.memory_space<vmem>>, vector<8x4xbf16>
    %c0_72 = arith.constant 0 : index
    %c92 = arith.constant 92 : index
    %134 = vector.load %arg6[%c0_72, %c92] : memref<8x96xbf16, #tpu.memory_space<vmem>>, vector<8x4xbf16>
    %cst_73 = arith.constant dense<0.000000e+00> : vector<8x8xf32>
    %135 = tpu.matmul %132, %133, %cst_73 {dimension_numbers = #tpu.dot_dimension_numbers<[1], [1], [0], [0], [0, 0, 1, 0], [], []>} : vector<8x4xbf16>, vector<8x4xbf16>, vector<8x8xf32> -> vector<8x8xf32>
    %cst_74 = arith.constant dense<0xFF800000> : vector<8xf32>
    %136 = vector.multi_reduction <maximumf>, %135, %cst_74 [1] : vector<8x8xf32> to vector<8xf32>
    %137 = vector.shape_cast %136 : vector<8xf32> to vector<8x1xf32>
    %138 = vector.broadcast %137 : vector<8x1xf32> to vector<8x8xf32>
    %139 = arith.subf %135, %138 : vector<8x8xf32>
    %140 = math.exp %139 : vector<8x8xf32>
    %cst_75 = arith.constant dense<0.000000e+00> : vector<8xf32>
    %141 = vector.multi_reduction <add>, %140, %cst_75 [1] : vector<8x8xf32> to vector<8xf32>
    %142 = vector.shape_cast %141 : vector<8xf32> to vector<8x1xf32>
    %143 = arith.truncf %140 : vector<8x8xf32> to vector<8x8xbf16>
    %cst_76 = arith.constant dense<0.000000e+00> : vector<8x4xf32>
    %144 = tpu.matmul %143, %134, %cst_76 {dimension_numbers = #tpu.dot_dimension_numbers<[1], [0], [0], [1], [0, 0, 1, 1], [], []>} : vector<8x8xbf16>, vector<8x4xbf16>, vector<8x4xf32> -> vector<8x4xf32>
    %145 = tpu.reciprocal %142 {approx = true} : vector<8x1xf32> -> vector<8x1xf32>
    %146 = vector.broadcast %145 : vector<8x1xf32> to vector<8x4xf32>
    %147 = arith.mulf %144, %146 : vector<8x4xf32>
    %148 = arith.truncf %147 : vector<8x4xf32> to vector<8x4xbf16>
    %c0_77 = arith.constant 0 : index
    %c28_78 = arith.constant 28 : index
    %149 = vector.load %arg7[%c0_77, %c28_78] : memref<8x32xbf16, #tpu.memory_space<vmem>>, vector<8x4xbf16>
    tpu.vector_store %arg7[%c0_77, %c28_78], %148 {strides = array<i32>} : memref<8x32xbf16, #tpu.memory_space<vmem>>, vector<8x4xbf16>,
    %c0_79 = arith.constant 0 : index
    %c0_80 = arith.constant 0 : index
    %150 = vector.load %arg7[%c0_79, %c0_80] : memref<8x32xbf16, #tpu.memory_space<vmem>>, vector<8x32xbf16>
    %c0_81 = arith.constant 0 : index
    %c0_82 = arith.constant 0 : index
    %151 = vector.load %arg3[%c0_81, %c0_82] : memref<32x32xbf16, #tpu.memory_space<vmem>>, vector<32x32xbf16>
    %cst_83 = arith.constant dense<0.000000e+00> : vector<8x32xf32>
    %152 = tpu.matmul %150, %151, %cst_83 {dimension_numbers = #tpu.dot_dimension_numbers<[1], [0], [0], [1], [0, 0, 1, 1], [], []>} : vector<8x32xbf16>, vector<32x32xbf16>, vector<8x32xf32> -> vector<8x32xf32>
    %c0_84 = arith.constant 0 : index
    %c0_85 = arith.constant 0 : index
    %153 = vector.load %arg4[%c0_84, %c0_85] : memref<1x32xf32, #tpu.memory_space<vmem>>, vector<1x32xf32>
    %154 = vector.broadcast %153 : vector<1x32xf32> to vector<8x32xf32>
    %155 = arith.addf %152, %154 : vector<8x32xf32>
    %c0_86 = arith.constant 0 : index
    %c0_87 = arith.constant 0 : index
    %c0_88 = arith.constant 0 : index
    %156 = vector.load %arg5[%c0_86, %c0_87, %c0_88] : memref<1x8x32xf32, #tpu.memory_space<vmem>>, vector<1x8x32xf32>
    %157 = vector.shape_cast %156 : vector<1x8x32xf32> to vector<8x32xf32>
    %158 = vector.shape_cast %155 : vector<8x32xf32> to vector<1x8x32xf32>
    tpu.vector_store %arg5[%c0_86, %c0_87, %c0_88], %158 {strides = array<i32>} : memref<1x8x32xf32, #tpu.memory_space<vmem>>, vector<1x8x32xf32>,
    return
  }
  func.func @transform_0(%arg0: i32) -> (i32, i32, i32) {
    %c0_i32 = arith.constant 0 : i32
    %c0_i32_0 = arith.constant 0 : i32
    %c0_i32_1 = arith.constant 0 : i32
    return %arg0, %c0_i32, %c0_i32_0 : i32, i32, i32
  }
  func.func @transform_1(%arg0: i32) -> (i32, i32) {
    %c0_i32 = arith.constant 0 : i32
    %c0_i32_0 = arith.constant 0 : i32
    %c0_i32_1 = arith.constant 0 : i32
    return %c0_i32, %c0_i32_0 : i32, i32
  }
  func.func @transform_2(%arg0: i32) -> (i32, i32) {
    %c0_i32 = arith.constant 0 : i32
    %c0_i32_0 = arith.constant 0 : i32
    %c0_i32_1 = arith.constant 0 : i32
    return %c0_i32, %c0_i32_0 : i32, i32
  }
  func.func @transform_3(%arg0: i32) -> (i32, i32) {
    %c0_i32 = arith.constant 0 : i32
    %c0_i32_0 = arith.constant 0 : i32
    %c0_i32_1 = arith.constant 0 : i32
    return %c0_i32, %c0_i32_0 : i32, i32
  }
  func.func @transform_4(%arg0: i32) -> (i32, i32, i32) {
    %c0_i32 = arith.constant 0 : i32
    %c0_i32_0 = arith.constant 0 : i32
    %c0_i32_1 = arith.constant 0 : i32
    return %arg0, %c0_i32, %c0_i32_0 : i32, i32, i32
  }
}

</mosaic_0001>

<bundles_post_ra>
// kernel: tpu_custom_call.1
= control target key start
LH: loop header
LB: loop body
LE: loop exit
PB: predicated region body
PF: predicated region fallthrough
CT: control target
= control target key end

     0   :  { %9 = vsyncpa [#allocation5], 0  ;;  %s2373_s0 = inlined_call_operand.hbm [shape: bf16[2,8,32], index: 0, kind: input, shape index: {}]   ;;  %s2374_s1 = inlined_call_operand.hbm [shape: bf16[32,96], index: 1, kind: input, shape index: {}]   ;;  %s2375_s2 = inlined_call_operand.hbm [shape: bf16[32,32], index: 2, kind: input, shape index: {}]   ;;  %s2376_s3 = inlined_call_operand.vmem [shape: f32[1,32], index: 3, kind: input, shape index: {}]   ;;  %s2377_s4 = inlined_call_operand.hbm [shape: f32[2,8,32], index: 4, kind: output, shape index: {}]  }
   0x1   :  { %11 = vsyncpa [#allocation5 + $0x1], 0 }
   0x2   :  { %12 = vsyncpa [#allocation8], 0 }
   0x3   :  { %13 = vsyncpa [#allocation6], 0 }
   0x4   :  { %15 = vsyncpa [#allocation6 + $0x1], 0  ;;  %s2026_s15 = smov 0   ;;  %s2028_s16 = smov 0  }
   0x5   :  { %s2030_s17 = smov 0   ;;  %s2032_s18 = smov 0  }
   0x6 LB: > { %s2047_s19 = sadd.s32 4294967295, %s1961_s18   ;;  %s1457_s20 = sadd.s32 4294967294, %s1961_s18   ;;  %s1961_s18 = sphi %s2032_s18, %s2399_s18   ;;  %s1957_s17 = sphi %s2030_s17, %s2398_s17   ;;  %s1953_s16 = sphi %s2028_s16, %s2397_s16   ;;  %s1949_s15 = sphi %s2026_s15, %s2396_s15  }
   0x7   : > { %p41_p0 = scmp.ne.s32.totalorder %s1953_s16, %s1949_s15  ;;  %p2378_p1 = scmp.eq.s32.totalorder %s2047_s19, 0 }
   0x8   : > { %p134_p3 = scmp.eq.s32.totalorder %s1457_s20, 1  ;;  %p1458_p5 = scmp.ge.s32.totalorder %s1961_s18, 1 }
   0x9   : > { %p2056_p4 = por %p2378_p1, %p41_p0  ;;  %p141_p7 = scmp.lt.s32.totalorder %s1961_s18, 3 }
   0xa   : > { %p2061_p6 = por %p134_p3, %p41_p0  ;;  %s1963_s24 = smov [#allocation7]  }
   0xb   : > { %s2382_s21 = scalar_select %p2056_p4, 1, 0 }
   0xc   : > { %s2383_s22 = scalar_select %p2061_p6, 1, 0 }
   0xd   : > { %p2066_p8 = pnand %p1458_p5, %p141_p7  ;;  %s153_s25 = sshll.u32 %s1963_s24, 4  ;;  %s154_s25 = int_to_ptr.vmem [resolvable:$true] %s153_s25 }
   0xe   : > { %s1964_s27 = smov [#allocation9]   ;;  %s1824_s29 = scalar_lea.vmem %s154_s25, 256 }
   0xf   : > { %s2384_s23 = scalar_select %p2066_p8, 1, 0 }
  0x10   : > { %p1680_p9 = pneg %p2066_p8  ;;  %s166_s28 = sshll.u32 %s1964_s27, 4  ;;  %s167_s28 = int_to_ptr.vmem [resolvable:$true] %s166_s28 }
  0x11   : > { %p1825_p13 = scmp.ne.s32.totalorder %s154_s25, %s1824_s29  ;;  %p1832_p5 = scmp.lt.s32.totalorder %s154_s25, %s154_s25 }
  0x12   : > { %p2075_p11 = pnand %p1680_p9, %p2378_p1  ;;  %p1833_p7 = scmp.lt.s32.totalorder %s1824_s29, %s1824_s29 }
  0x14   : > { %p1815_p12 = pneg %p2075_p11  ;;  %p1834_p10 = por %p1833_p7, %p1832_p5 }
  0x16   : > { %p1827_p0 = pnand %p1825_p13, %p1815_p12 }
  0x18   : > { %p1828_p3 = pneg %p1827_p0 }
  0x1a   : > { %p1835_p9 = pnand %p1834_p10, %p1828_p3 }
  0x1c   : > { %1838 = shalt.err (!%p1835_p9)
}
  0x1d   : > { %s1965_s30 = smov 64   ;;  %s1966_s5 = smov 4  }
  0x1e   : > { %1683 = dma.hbm_to_vmem [thread:$0]  (!%p2075_p11), %s2374_s1, 256, %s154_s25, [#allocation8], %s1965_s30, %s1965_s30, %s1966_s5  }
  0x1f   : > { %s1850_s8 = scalar_lea.vmem %s167_s28, 256  ;;  %p1858_p2 = scmp.lt.s32.totalorder %s167_s28, %s167_s28 }
  0x20   : > { %p1851_p1 = scmp.ne.s32.totalorder %s167_s28, %s1850_s8  ;;  %p1859_p6 = scmp.lt.s32.totalorder %s1850_s8, %s1850_s8 }
  0x22   : > { %p1853_p13 = pnand %p1851_p1, %p1815_p12  ;;  %p1860_p5 = por %p1859_p6, %p1858_p2 }
  0x24   : > { %p1854_p0 = pneg %p1853_p13 }
  0x26   : > { %p1861_p10 = pnand %p1860_p5, %p1854_p0 }
  0x28   : > { %1864 = shalt.err (!%p1861_p10)
}
  0x29   : > { %1686 = dma.hbm_to_vmem [thread:$0]  (!%p2075_p11), %s2375_s2, 256, %s167_s28, [#allocation8], %s1965_s30, %s1965_s30, %s1966_s5  }
  0x2a   : > { %s2098_s11 = sadd.s32 1, %s1961_s18   ;;  %s28_s12 = sadd.s32 1, %s1957_s17 }
  0x2b   : > { %s25_s13 = ssub.s32 %s1961_s18, %s2098_s11  ;;  %p35_p1 = scmp.ne.s32.totalorder %s1957_s17, %s1953_s16 }
  0x2c   : > { %p26_p2 = scmp.eq.s32.totalorder %s25_s13, 0  ;;  %p36_p6 = scmp.eq.s32.totalorder %s1961_s18, 0 }
  0x2d   : > { %p2386_p12 = scmp.eq.s32.totalorder %s2047_s19, 1  ;;  %p1697_p7 = scmp.lt.s32.totalorder %s1961_s18, 2 }
  0x2e   : > { %s2114_s20 = scalar_select %p26_p2, %s1957_s17, %s28_s12  }
  0x2f   : > { %p2108_p3 = por %p2386_p12, %p35_p1  ;;  %p37_p9 = por %p36_p6, %p35_p1 }
  0x30   : > { %s183_s24 = sand.u32 1, %s1957_s17   ;;  %s1463_s26 = sshll.u32 %s1961_s18, 6 }
  0x31   : > { %s2387_s14 = scalar_select %p2108_p3, 1, 0 }
  0x32   : > { %s1462_s25 = sshll.u32 %s183_s24, 2  ;;  %s2121_s29 = scalar_lea.hbm %s2373_s0, %s1463_s26 }
  0x33   : > { %s187_s30 = scalar_lea.vmem [#allocation4], %s1462_s25  ;;  %p2123_p11 = pnand %p1697_p7, %p37_p9 }
  0x34   : > { %s194_s5 = sshll.u32 %s187_s30, 4  ;;  %s184_s7 = scalar_lea.sflag [#allocation5], %s183_s24  ;;  %s195_s5 = int_to_ptr.vmem [resolvable:$true] %s194_s5 }
  0x35   : > { %s1865_s8 = scalar_lea.hbm %s2121_s29, 64  ;;  %p1867_p0 = pneg %p2123_p11 }
  0x36   : > { %p1866_p13 = scmp.ne.s32.totalorder %s2121_s29, %s1865_s8  ;;  %s1870_s12 = scalar_lea.hbm %s2373_s0, 128 }
  0x37   : > { %p1871_p1 = scmp.lt.s32.totalorder %s2121_s29, %s2373_s0  ;;  %p1872_p2 = scmp.lt.s32.totalorder %s1870_s12, %s1865_s8 }
  0x38   : > { %p1868_p5 = pnand %p1867_p0, %p1866_p13 }
  0x39   : > { %p1873_p6 = por %p1872_p2, %p1871_p1 }
  0x3a   : > { %p1869_p10 = pneg %p1868_p5 }
  0x3c   : > { %p1874_p12 = pnand %p1873_p6, %p1869_p10 }
  0x3e   : > { %1877 = shalt.err (!%p1874_p12)
}
  0x3f   : > { %s1878_s26 = scalar_lea.vmem %s195_s5, 64  ;;  %s1967_s24 = smov [#allocation4]  }
  0x40   : > { %p1879_p7 = scmp.ne.s32.totalorder %s195_s5, %s1878_s26  ;;  %s1883_s27 = sshll.u32 %s1967_s24, 4  ;;  %s1884_s27 = int_to_ptr.vmem [resolvable:$false] %s1883_s27 }
  0x41   : > { %s1885_s28 = scalar_lea.vmem %s1884_s27, 128  ;;  %p1886_p13 = scmp.lt.s32.totalorder %s195_s5, %s1884_s27 }
  0x42   : > { %p1881_p9 = pnand %p1879_p7, %p1867_p0  ;;  %p1887_p5 = scmp.lt.s32.totalorder %s1885_s28, %s1878_s26 }
  0x44   : > { %p1882_p3 = pneg %p1881_p9  ;;  %p1888_p4 = por %p1887_p5, %p1886_p13 }
  0x46   : > { %p1889_p8 = pnand %p1888_p4, %p1882_p3 }
  0x48   : > { %1892 = shalt.err (!%p1889_p8)
}
  0x49   : > { %1690 = dma.hbm_to_vmem [thread:$0]  (!%p2123_p11), %s2121_s29, 64, %s195_s5, %s184_s7  }
  0x4a   : > { %p2389_p10 = scmp.ne.s32.totalorder %s2384_s23, 0 }
  0x4b   : > { %s2144_s30 = sand.u32 (!%p2389_p10), 1, %s1953_s16   ;;  %p2390_p0 = scmp.ne.s32.totalorder (!%p2389_p10), %s2382_s21, 0 }
  0x4c   : > { %203 = sbr.rel (%p2389_p10) target bundleno = 1390 (0x56e), region = 36  ;;  %s1465_s8 = sshll.u32 (!%p2389_p10), %s2144_s30, 2 }
  0x4d   : > { %s206_s9 = scalar_lea.sflag (!%p2389_p10), [#allocation5], %s2144_s30  ;;  %s209_s10 = scalar_lea.vmem (!%p2389_p10), [#allocation4], %s1465_s8 }
  0x51   : > { %1936 = dma.done.wait (%p2390_p0), %s206_s9, 64  }
  0x52   : > { %1938 = vsyncadd (%p2390_p0), %s206_s9, 4294967232  ;;  %p2391_p4 = scmp.eq.s32.totalorder %s2047_s19, 0 }
  0x54   : > { %1940 = dma.done.wait (%p2391_p4), [#allocation8], 512   ;;  %p2392_p8 = pmov %p2391_p4 }
  0x55   : > { %v1968_v0 = vmov 0.0   ;;  %vm1969_vm0 = vmmov 0   ;;  %v1769_v1 = vld [vmem:[#allocation7 + $0x8] sm:$0xff]   ;;  %v1770_v2 = vld [vmem:[#allocation7] sm:$0xff]   ;;  %v243_v3 = vld [vmem:[%s209_s10] sm:$0xf] }
  0x56   : > { %1942 = vsyncadd (%p2392_p8), [#allocation8], 4294966784  ;;  %1556 = vmatprep.subr.bf16.mxu0 %v1968_v0  ;;  %1560 = vmatprep.mubr.msk.bf16.mxu0 %vm1969_vm0, %v1968_v0  ;;  %vm260_vm1 = vcmask 261120   ;;  %vm305_vm2 = vcmask 781312   ;;  %s1970_s21 = smov 124   ;;  %s1971_s23 = smov 96  }
  0x57   : > { %1564 = vmatprep.subr.bf16.mxu1 %v1968_v0  ;;  %1566 = vmatprep.mubr.msk.bf16.mxu1 %vm1969_vm0, %v1968_v0  ;;  %s1972_s29 = smov 88   ;;  %s1973_s5 = smov 92   ;;  %vm313_vm3 = vcmask 31744   ;;  %vm376_vm4 = vcmask 1043456   ;;  %vm360_vm5 = vcmask 64512   ;;  %vm423_vm6 = vcmask 27648  }
  0x58   : > { %1557 = vmatpush3.bf16.msra.mxu0 %v1769_v1  ;;  %s1974_s6 = smov 84   ;;  %s1975_s7 = smov 120   ;;  %vm546_vm7 = vcmask 60448   ;;  %vm669_vm8 = vcmask 93248   ;;  %vm792_vm9 = vcmask 126048   ;;  %vm915_vm10 = vcmask 158848  }
  0x59   : > { %1558 = vmatprep.subr.bf16.mxu0 %v1968_v0  ;;  %s1976_s12 = smov 80   ;;  %s1977_s13 = smov 116   ;;  %vm1038_vm11 = vcmask 191648   ;;  %vm1161_vm12 = vcmask 224448   ;;  %vm1284_vm13 = vcmask 257248  }
  0x5a   : > { %s1978_s25 = smov 76   ;;  %s1979_s26 = smov 112  }
  0x5b   : > { %s1980_s24 = smov 72   ;;  %s1981_s27 = smov 108  }
  0x5c   : > { %1559 = vmatpush3.bf16.msra.mxu0 %v1770_v2  ;;  %s1982_s28 = smov 68   ;;  %s1983_s8 = smov 104  }
  0x5d   : > { %1570 = vmatprep.subr.bf16.mxu0 %v1968_v0  ;;  %s1984_s9 = smov 60   ;;  %s1985_s10 = smov 100  }
  0x5e   : > { %p2393_p11 = scmp.ne.s32.totalorder %s2387_s14, 0 }
  0x5f   : > { %1561 = vmatmul.mubr.msk.bf16.vlgmr.msra.gmra.mxu0 %vm260_vm1, %v243_v3 }
  0x60   : > { %1572 = vmatprep.mubr.msk.bf16.mxu0 %vm1969_vm0, %v1968_v0 }
 0x11f   : > { %v298_v4 = vpop.f32.mrf.mxu0 }
 0x120   : > { %v304_v5 = vpack.c.bf16 %v298_v4, %v298_v4 }
 0x121   : > { %v1562_v6 = vpop.f32.mrf.mxu0 }
 0x122   : > { %306 = vst.msk [vmem:[#allocation2] sm:$0xf] %vm305_vm2, %v304_v5 }
 0x123   : > { %v301_v7 = vpop.f32.mrf.mxu0 }
 0x125   : > { %v1563_v8 = vpop.f32.mrf.mxu0 }
 0x129   : > { %v1771_v9 = vld [vmem:[#allocation2] ss:$0 sps:$4 sm:$0xff]  }
 0x12a   : > { %v307_v10 = vld [vmem:[#allocation2] sm:$0xf]  ;;  %429 = vrot.lane.b32.xlu1 %v1771_v9, %s1970_s21  ;;  %s1986_s21 = smov 64  }
 0x12b   : > { %v1472_v11 = vcombine.low %v307_v10, %v307_v10  ;;  %v2167_v12 = vld [vmem:[#allocation2] ss:$0 sps:$4 sm:$0xff]  }
 0x12c   : > { %v2170_v13 = vld [vmem:[#allocation2] ss:$0 sps:$4 sm:$0xff]  }
 0x12d   : > { %311 = vrot.lane.b32.xlu0 %v1472_v11, %s1971_s23  ;;  %v2174_v14 = vld [vmem:[#allocation2] ss:$0 sps:$4 sm:$0xff]   ;;  %s1987_s23 = smov 56  }
 0x12e   : > { %554 = vrot.lane.b32.xlu1 %v2167_v12, %s1972_s29  ;;  %v2178_v15 = vld [vmem:[#allocation2] ss:$0 sps:$4 sm:$0xff]   ;;  %s1988_s29 = smov 52  }
 0x12f   : > { %v2182_v16 = vld [vmem:[#allocation2] ss:$0 sps:$4 sm:$0xff]  }
 0x130   : > { %v2186_v17 = vld [vmem:[#allocation2] ss:$0 sps:$4 sm:$0xff]  }
 0x131   : > { %431 = vrot.lane.b32.xlu0 %v1771_v9, %s1973_s5  ;;  %s1989_s5 = smov 48  }
 0x132   : > { %677 = vrot.lane.b32.xlu1 %v2170_v13, %s1974_s6  ;;  %s1990_s6 = smov 44  }
 0x135   : > { %552 = vrot.lane.b32.xlu0 %v2167_v12, %s1975_s7  ;;  %s1991_s7 = smov 40  }
 0x136   : > { %800 = vrot.lane.b32.xlu1 %v2174_v14, %s1976_s12  ;;  %s1992_s12 = smov 36  }
 0x139   : > { %675 = vrot.lane.b32.xlu0 %v2170_v13, %s1977_s13  ;;  %s1993_s13 = smov 4  }
 0x13a   : > { %923 = vrot.lane.b32.xlu1 %v2178_v15, %s1978_s25  ;;  %s1994_s25 = smov 8  }
 0x13d   : > { %798 = vrot.lane.b32.xlu0 %v2174_v14, %s1979_s26  ;;  %s1995_s26 = smov 12  }
 0x13e   : > { %1046 = vrot.lane.b32.xlu1 %v2182_v16, %s1980_s24  ;;  %s1996_s24 = smov 16  }
 0x141   : > { %921 = vrot.lane.b32.xlu0 %v2178_v15, %s1981_s27  ;;  %s1997_s27 = smov 20  }
 0x142   : > { %1169 = vrot.lane.b32.xlu1 %v2186_v17, %s1982_s28  ;;  %s1998_s28 = smov 24  }
 0x145   : > { %1044 = vrot.lane.b32.xlu0 %v2182_v16, %s1983_s8  ;;  %s1999_s8 = smov 28  }
 0x146   : > { %489 = vrot.lane.b32.xlu1 %v1771_v9, %s1984_s9  ;;  %s1468_s9 = sshll.u32 %s2144_s30, 3 }
 0x149   : > { %1167 = vrot.lane.b32.xlu0 %v2186_v17, %s1985_s10 }
 0x14d   : > { %371 = vrot.lane.b32.xlu0 %v1472_v11, %s1986_s21 }
 0x19c   : > { %v430_v21 = vpop.permute.xlu1 %429 }
 0x19f   : > { %v312_v18 = vpop.permute.xlu0 %311 }
 0x1a0   : > { %v318_v19 = vsel %vm313_vm3, %v312_v18, 0  ;;  %v555_v25 = vpop.permute.xlu1 %554 }
 0x1a1   : > { %1565 = vmatpush3.bf16.xpose.msra.mxu1 %v318_v19  ;;  %v560_v27 = vsel %vm313_vm3, %v555_v25, 0 }
 0x1a2   : > { %1576 = vmatprep.subr.bf16.mxu1 %v1968_v0 }
 0x1a3   : > { %v432_v20 = vpop.permute.xlu0 %431 }
 0x1a4   : > { %v437_v23 = vsel %vm313_vm3, %v432_v20, 0  ;;  %v678_v29 = vpop.permute.xlu1 %677 }
 0x1a5   : > { %v683_v31 = vsel %vm313_vm3, %v678_v29, 0 }
 0x1a7   : > { %v553_v22 = vpop.permute.xlu0 %552 }
 0x1a8   : > { %1567 = vmatmul.mubr.msk.bf16.vlgmr.msra.gmra.mxu1 %vm313_vm3, %v307_v10  ;;  %v801_v33 = vpop.permute.xlu1 %800 }
 0x1a9   : > { %1577 = vmatpush3.bf16.xpose.msra.mxu1 %v437_v23  ;;  %1578 = vmatprep.mubr.msk.bf16.mxu1 %vm1969_vm0, %v1968_v0  ;;  %v806_v35 = vsel %vm313_vm3, %v801_v33, 0 }
 0x1aa   : > { %1588 = vmatprep.subr.bf16.mxu1 %v1968_v0 }
 0x1ab   : > { %v676_v24 = vpop.permute.xlu0 %675 }
 0x1ac   : > { %v924_v37 = vpop.permute.xlu1 %923 }
 0x1ad   : > { %v929_v38 = vsel %vm313_vm3, %v924_v37, 0 }
 0x1af   : > { %v799_v26 = vpop.permute.xlu0 %798 }
 0x1b0   : > { %1579 = vmatmul.mubr.msk.bf16.vlgmr.msra.gmra.mxu1 %vm313_vm3, %v430_v21  ;;  %v1047_v39 = vpop.permute.xlu1 %1046 }
 0x1b1   : > { %1589 = vmatpush3.bf16.xpose.msra.mxu1 %v560_v27  ;;  %1590 = vmatprep.mubr.msk.bf16.mxu1 %vm1969_vm0, %v1968_v0  ;;  %v1052_v40 = vsel %vm313_vm3, %v1047_v39, 0 }
 0x1b2   : > { %1600 = vmatprep.subr.bf16.mxu1 %v1968_v0 }
 0x1b3   : > { %v922_v28 = vpop.permute.xlu0 %921 }
 0x1b4   : > { %v1170_v41 = vpop.permute.xlu1 %1169 }
 0x1b5   : > { %v1175_v42 = vsel %vm313_vm3, %v1170_v41, 0 }
 0x1b7   : > { %v1045_v30 = vpop.permute.xlu0 %1044 }
 0x1b8   : > { %1591 = vmatmul.mubr.msk.bf16.vlgmr.msra.gmra.mxu1 %vm313_vm3, %v553_v22 }
 0x1b9   : > { %1601 = vmatpush3.bf16.xpose.msra.mxu1 %v683_v31  ;;  %1602 = vmatprep.mubr.msk.bf16.mxu1 %vm1969_vm0, %v1968_v0 }
 0x1ba   : > { %1612 = vmatprep.subr.bf16.mxu1 %v1968_v0 }
 0x1bb   : > { %v1168_v32 = vpop.permute.xlu0 %1167 }
 0x1bf   : > { %v372_v34 = vpop.permute.xlu0 %371 }
 0x1c0   : > { %v378_v36 = vsel %vm376_vm4, %v372_v34, 0  ;;  %1603 = vmatmul.mubr.msk.bf16.vlgmr.msra.gmra.mxu1 %vm313_vm3, %v676_v24  ;;  %v490_v24 = vpop.permute.xlu1 %489 }
 0x1c1   : > { %1571 = vmatpush3.bf16.msra.mxu0 %v378_v36  ;;  %1613 = vmatpush3.bf16.xpose.msra.mxu1 %v806_v35 }
 0x1c2   : > { %1614 = vmatprep.mubr.msk.bf16.mxu1 %vm1969_vm0, %v1968_v0  ;;  %1624 = vmatprep.subr.bf16.mxu1 %v1968_v0 }
 0x1c3   : > { %1582 = vmatprep.subr.bf16.mxu0 %v1968_v0 }
 0x1c8   : > { %1615 = vmatmul.mubr.msk.bf16.vlgmr.msra.gmra.mxu1 %vm313_vm3, %v799_v26 }
 0x1c9   : > { %1625 = vmatpush3.bf16.xpose.msra.mxu1 %v929_v38  ;;  %1626 = vmatprep.mubr.msk.bf16.mxu1 %vm1969_vm0, %v1968_v0 }
 0x1ca   : > { %1636 = vmatprep.subr.bf16.mxu1 %v1968_v0 }
 0x1d0   : > { %1627 = vmatmul.mubr.msk.bf16.vlgmr.msra.gmra.mxu1 %vm313_vm3, %v922_v28 }
 0x1d1   : > { %1637 = vmatpush3.bf16.xpose.msra.mxu1 %v1052_v40  ;;  %1638 = vmatprep.mubr.msk.bf16.mxu1 %vm1969_vm0, %v1968_v0 }
 0x1d2   : > { %1648 = vmatprep.subr.bf16.mxu1 %v1968_v0 }
 0x1d8   : > { %1639 = vmatmul.mubr.msk.bf16.vlgmr.msra.gmra.mxu1 %vm313_vm3, %v1045_v30 }
 0x1d9   : > { %1649 = vmatpush3.bf16.xpose.msra.mxu1 %v1175_v42  ;;  %1650 = vmatprep.mubr.msk.bf16.mxu1 %vm1969_vm0, %v1968_v0 }
 0x1da   : > { %1660 = vmatprep.subr.bf16.mxu1 %v1968_v0 }
 0x1e0   : > { %1651 = vmatmul.mubr.msk.bf16.vlgmr.msra.gmra.mxu1 %vm313_vm3, %v1168_v32 }
 0x1e1   : > { %1664 = vmatprep.mubr.msk.bf16.mxu1 %vm1969_vm0, %v1968_v0 }
 0x268   : > { %v2233_v43 = vpop.f32.mrf.mxu1 }
 0x269   : > { %v361_v44 = vsel %vm360_vm5, %v2233_v43, -inf }
 0x26a   : > { %362 = vmax.xlane.f32.xlu1 %v361_v44  ;;  %v1568_v45 = vpop.f32.mrf.mxu1 }
 0x26c   : > { %v357_v46 = vpop.f32.mrf.mxu1 }
 0x26e   : > { %v1569_v47 = vpop.f32.mrf.mxu1 }
 0x270   : > { %v473_v48 = vpop.f32.mrf.mxu1 }
 0x271   : > { %v479_v49 = vsel %vm360_vm5, %v473_v48, -inf }
 0x272   : > { %480 = vmax.xlane.f32.xlu0 %v479_v49  ;;  %v1580_v50 = vpop.f32.mrf.mxu1 }
 0x274   : > { %v476_v51 = vpop.f32.mrf.mxu1 }
 0x276   : > { %v1581_v52 = vpop.f32.mrf.mxu1 }
 0x278   : > { %v596_v53 = vpop.f32.mrf.mxu1 }
 0x279   : > { %v602_v54 = vsel %vm360_vm5, %v596_v53, -inf }
 0x27a   : > { %603 = vmax.xlane.f32.xlu0 %v602_v54  ;;  %v1592_v55 = vpop.f32.mrf.mxu1 }
 0x27b   : > { %612 = vrot.lane.b32.xlu1 %v2167_v12, %s1987_s23  ;;  %s1508_s23 = sshll.u32 %s2047_s19, 7 }
 0x27c   : > { %v599_v56 = vpop.f32.mrf.mxu1 }
 0x27e   : > { %v1593_v57 = vpop.f32.mrf.mxu1 }
 0x280   : > { %v2240_v58 = vpop.f32.mrf.mxu1 }
 0x281   : > { %v725_v11 = vsel %vm360_vm5, %v2240_v58, -inf }
 0x282   : > { %v1604_v59 = vpop.f32.mrf.mxu1 }
 0x284   : > { %v722_v60 = vpop.f32.mrf.mxu1 }
 0x286   : > { %v1605_v61 = vpop.f32.mrf.mxu1 }
 0x288   : > { %v2242_v62 = vpop.f32.mrf.mxu1 }
 0x28a   : > { %v1616_v63 = vpop.f32.mrf.mxu1 }
 0x28c   : > { %v845_v1 = vpop.f32.mrf.mxu1 }
 0x28e   : > { %v1617_v2 = vpop.f32.mrf.mxu1 }
 0x290   : > { %735 = vrot.lane.b32.xlu0 %v2170_v13, %s1988_s29  ;;  %v2245_v3 = vpop.f32.mrf.mxu1  ;;  %v848_v13 = vsel %vm360_vm5, %v2242_v62, -inf  ;;  %s241_s29 = scalar_lea.vmem [#allocation10], %s1468_s9 }
 0x291   : > { %v971_v23 = vsel %vm360_vm5, %v2245_v3, -inf }
 0x292   : > { %v1628_v4 = vpop.f32.mrf.mxu1 }
 0x294   : > { %v968_v5 = vpop.f32.mrf.mxu1 }
 0x296   : > { %v1629_v6 = vpop.f32.mrf.mxu1 }
 0x298   : > { %v2247_v7 = vpop.f32.mrf.mxu1 }
 0x299   : > { %v1094_v21 = vsel %vm360_vm5, %v2247_v7, -inf }
 0x29a   : > { %v1640_v8 = vpop.f32.mrf.mxu1 }
 0x29c   : > { %v1091_v9 = vpop.f32.mrf.mxu1 }
 0x29e   : > { %v1641_v10 = vpop.f32.mrf.mxu1 }
 0x29f   : > { %726 = vmax.xlane.f32.xlu1 %v725_v11 }
 0x2a0   : > { %v2251_v12 = vpop.f32.mrf.mxu1 }
 0x2a1   : > { %v1217_v22 = vsel %vm360_vm5, %v2251_v12, -inf }
 0x2a2   : > { %v1652_v18 = vpop.f32.mrf.mxu1 }
 0x2a3   : > { %849 = vmax.xlane.f32.xlu1 %v848_v13 }
 0x2a4   : > { %v1214_v19 = vpop.f32.mrf.mxu1 }
 0x2a6   : > { %v1653_v20 = vpop.f32.mrf.mxu1 }
 0x2a7   : > { %1095 = vmax.xlane.f32.xlu1 %v1094_v21 }
 0x2ab   : > { %1218 = vmax.xlane.f32.xlu1 %v1217_v22 }
 0x2af   : > { %972 = vmax.xlane.f32.xlu0 %v971_v23 }
 0x2bc   : > { %858 = vrot.lane.b32.xlu1 %v2174_v14, %s1989_s5  ;;  %s1368_s5 = sshll.u32 %s241_s29, 4  ;;  %s2331_s5 = int_to_ptr.vmem [resolvable:$true] %s1368_s5 }
 0x2bd   : > { %s1893_s19 = scalar_lea.vmem %s2331_s5, 128 }
 0x2be   : > { %p1894_p3 = scmp.ne.s32.totalorder %s2331_s5, %s1893_s19 }
 0x2c0   : > { %p1895_p1 = pnand %p1894_p3, %p2393_p11 }
 0x2c2   : > { %p1896_p2 = pneg %p1895_p1 }
 0x2c5   : > { %981 = vrot.lane.b32.xlu0 %v2178_v15, %s1990_s6 }
 0x2c9   : > { %1104 = vrot.lane.b32.xlu0 %v2182_v16, %s1991_s7 }
 0x2cd   : > { %1227 = vrot.lane.b32.xlu0 %v2186_v17, %s1992_s12  ;;  %v495_v17 = vsel %vm376_vm4, %v490_v24, 0  ;;  %s2329_s12 = scalar_lea.hbm %s2377_s4, %s1508_s23 }
 0x2f3   : > { %v363_v25 = vpop.xlane.xlu1 %362 }
 0x2f4   : > { %v364_v26 = vsub.f32 %v2233_v43, %v363_v25 }
 0x2f6   : > { %v365_v27 = vmul.f32 1.442695, %v364_v26 }
 0x2f7   : > { %v613_v34 = vpop.permute.xlu1 %612 }
 0x2f8   : > { %1781 = vpow2.f32 %v365_v27  ;;  %v618_v37 = vsel %vm376_vm4, %v613_v34, 0 }
 0x2fb   : > { %v481_v28 = vpop.xlane.xlu0 %480 }
 0x2fc   : > { %v482_v29 = vsub.f32 %v473_v48, %v481_v28 }
 0x2fe   : > { %v483_v30 = vmul.f32 1.442695, %v482_v29 }
 0x300   : > { %1783 = vpow2.f32 %v483_v30 }
 0x303   : > { %v604_v14 = vpop.xlane.xlu0 %603 }
 0x304   : > { %v605_v31 = vsub.f32 %v596_v53, %v604_v14 }
 0x305   : > { %v2266_v32 = vpop.eup %1781 }
 0x306   : > { %v606_v15 = vmul.f32 1.442695, %v605_v31  ;;  %v370_v16 = vpack.c.bf16 %v2266_v32, %v2266_v32 }
 0x307   : > { %v736_v39 = vpop.permute.xlu0 %735 }
 0x308   : > { %1785 = vpow2.f32 %v606_v15  ;;  %1573 = vmatmul.mubr.msk.bf16.vlgmr.msra.gmra.mxu0 %vm360_vm5, %v370_v16  ;;  %v741_v42 = vsel %vm376_vm4, %v736_v39, 0 }
 0x309   : > { %1583 = vmatpush3.bf16.msra.mxu0 %v495_v17  ;;  %1584 = vmatprep.mubr.msk.bf16.mxu0 %vm1969_vm0, %v1968_v0 }
 0x30a   : > { %1594 = vmatprep.subr.bf16.mxu0 %v1968_v0 }
 0x30d   : > { %v1784_v33 = vpop.eup %1783 }
 0x30e   : > { %v485_v35 = vsel %vm360_vm5, %v1784_v33, 0.0  ;;  %v488_v36 = vpack.c.bf16 %v1784_v33, %v1784_v33 }
 0x30f   : > { %486 = vadd.xlane.f32.xlu1 %v485_v35 }
 0x310   : > { %1585 = vmatmul.mubr.msk.bf16.vlgmr.msra.gmra.mxu0 %vm360_vm5, %v488_v36 }
 0x311   : > { %1595 = vmatpush3.bf16.msra.mxu0 %v618_v37  ;;  %1596 = vmatprep.mubr.msk.bf16.mxu0 %vm1969_vm0, %v1968_v0 }
 0x312   : > { %1606 = vmatprep.subr.bf16.mxu0 %v1968_v0 }
 0x315   : > { %v1786_v38 = vpop.eup %1785 }
 0x316   : > { %v608_v40 = vsel %vm360_vm5, %v1786_v38, 0.0  ;;  %v611_v41 = vpack.c.bf16 %v1786_v38, %v1786_v38 }
 0x317   : > { %609 = vadd.xlane.f32.xlu0 %v608_v40 }
 0x318   : > { %1597 = vmatmul.mubr.msk.bf16.vlgmr.msra.gmra.mxu0 %vm360_vm5, %v611_v41 }
 0x319   : > { %1607 = vmatpush3.bf16.msra.mxu0 %v741_v42  ;;  %1608 = vmatprep.mubr.msk.bf16.mxu0 %vm1969_vm0, %v1968_v0 }
 0x31a   : > { %1618 = vmatprep.subr.bf16.mxu0 %v1968_v0 }
 0x328   : > { %v727_v43 = vpop.xlane.xlu1 %726 }
 0x329   : > { %v728_v44 = vsub.f32 %v2240_v58, %v727_v43 }
 0x32b   : > { %v729_v45 = vmul.f32 1.442695, %v728_v44 }
 0x32c   : > { %v850_v46 = vpop.xlane.xlu1 %849 }
 0x32d   : > { %1787 = vpow2.f32 %v729_v45  ;;  %v851_v47 = vsub.f32 %v2242_v62, %v850_v46 }
 0x32f   : > { %v852_v48 = vmul.f32 1.442695, %v851_v47 }
 0x330   : > { %v1096_v49 = vpop.xlane.xlu1 %1095 }
 0x331   : > { %1789 = vpow2.f32 %v852_v48  ;;  %v1097_v50 = vsub.f32 %v2247_v7, %v1096_v49  ;;  %v367_v7 = vsel %vm360_vm5, %v2266_v32, 0.0 }
 0x333   : > { %v1098_v51 = vmul.f32 1.442695, %v1097_v50 }
 0x334   : > { %v1219_v52 = vpop.xlane.xlu1 %1218 }
 0x335   : > { %1791 = vpow2.f32 %v1098_v51  ;;  %v1220_v53 = vsub.f32 %v2251_v12, %v1219_v52 }
 0x337   : > { %v1221_v58 = vmul.f32 1.442695, %v1220_v53 }
 0x338   : > { %v973_v54 = vpop.xlane.xlu0 %972  ;;  %v859_v57 = vpop.permute.xlu1 %858 }
 0x339   : > { %v974_v55 = vsub.f32 %v2245_v3, %v973_v54  ;;  %v864_v62 = vsel %vm376_vm4, %v859_v57, 0 }
 0x33a   : > { %v1788_v56 = vpop.eup %1787 }
 0x33b   : > { %v975_v59 = vmul.f32 1.442695, %v974_v55  ;;  %v731_v60 = vsel %vm360_vm5, %v1788_v56, 0.0  ;;  %v734_v61 = vpack.c.bf16 %v1788_v56, %v1788_v56 }
 0x33c   : > { %732 = vadd.xlane.f32.xlu0 %v731_v60  ;;  %v982_v3 = vpop.permute.xlu0 %981 }
 0x33d   : > { %1793 = vpow2.f32 %v975_v59  ;;  %1609 = vmatmul.mubr.msk.bf16.vlgmr.msra.gmra.mxu0 %vm360_vm5, %v734_v61  ;;  %v987_v6 = vsel %vm376_vm4, %v982_v3, 0 }
 0x33e   : > { %v1790_v63 = vpop.eup %1789  ;;  %1619 = vmatpush3.bf16.msra.mxu0 %v864_v62  ;;  %1620 = vmatprep.mubr.msk.bf16.mxu0 %vm1969_vm0, %v1968_v0  ;;  %1795 = vpow2.f32 %v1221_v58 }
 0x33f   : > { %v854_v1 = vsel %vm360_vm5, %v1790_v63, 0.0  ;;  %1630 = vmatprep.subr.bf16.mxu0 %v1968_v0  ;;  %v857_v5 = vpack.c.bf16 %v1790_v63, %v1790_v63 }
 0x340   : > { %855 = vadd.xlane.f32.xlu1 %v854_v1  ;;  %v1105_v9 = vpop.permute.xlu0 %1104 }
 0x341   : > { %v1110_v18 = vsel %vm376_vm4, %v1105_v9, 0 }
 0x342   : > { %v1792_v2 = vpop.eup %1791 }
 0x343   : > { %v1100_v4 = vsel %vm360_vm5, %v1792_v2, 0.0  ;;  %v1103_v20 = vpack.c.bf16 %v1792_v2, %v1792_v2 }
 0x344   : > { %1101 = vadd.xlane.f32.xlu1 %v1100_v4  ;;  %v1228_v19 = vpop.permute.xlu0 %1227 }
 0x345   : > { %1621 = vmatmul.mubr.msk.bf16.vlgmr.msra.gmra.mxu0 %vm360_vm5, %v857_v5  ;;  %v1233_v21 = vsel %vm376_vm4, %v1228_v19, 0 }
 0x346   : > { %1631 = vmatpush3.bf16.msra.mxu0 %v987_v6  ;;  %1632 = vmatprep.mubr.msk.bf16.mxu0 %vm1969_vm0, %v1968_v0 }
 0x347   : > { %1642 = vmatprep.subr.bf16.mxu0 %v1968_v0 }
 0x348   : > { %368 = vadd.xlane.f32.xlu1 %v367_v7 }
 0x34a   : > { %v1794_v8 = vpop.eup %1793 }
 0x34b   : > { %v977_v10 = vsel %vm360_vm5, %v1794_v8, 0.0  ;;  %v980_v11 = vpack.c.bf16 %v1794_v8, %v1794_v8  ;;  %v1796_v12 = vpop.eup %1795  ;;  %v1779_v8 = vld [vmem:[#allocation9 + $0x8] sm:$0xff]  }
 0x34c   : > { %978 = vadd.xlane.f32.xlu0 %v977_v10  ;;  %v1223_v13 = vsel %vm360_vm5, %v1796_v12, 0.0  ;;  %v1226_v22 = vpack.c.bf16 %v1796_v12, %v1796_v12  ;;  %1661 = vmatpush3.bf16.msra.mxu1 %v1779_v8 }
 0x34d   : > { %1633 = vmatmul.mubr.msk.bf16.vlgmr.msra.gmra.mxu0 %vm360_vm5, %v980_v11  ;;  %v1780_v11 = vld [vmem:[#allocation9] sm:$0xff]   ;;  %1662 = vmatprep.subr.bf16.mxu1 %v1968_v0 }
 0x34e   : > { %1643 = vmatpush3.bf16.msra.mxu0 %v1110_v18  ;;  %1644 = vmatprep.mubr.msk.bf16.mxu0 %vm1969_vm0, %v1968_v0 }
 0x34f   : > { %1654 = vmatprep.subr.bf16.mxu0 %v1968_v0 }
 0x350   : > { %1224 = vadd.xlane.f32.xlu0 %v1223_v13  ;;  %1663 = vmatpush3.bf16.msra.mxu1 %v1780_v11 }
 0x355   : > { %1645 = vmatmul.mubr.msk.bf16.vlgmr.msra.gmra.mxu0 %vm360_vm5, %v1103_v20 }
 0x356   : > { %1655 = vmatpush3.bf16.msra.mxu0 %v1233_v21  ;;  %1656 = vmatprep.mubr.msk.bf16.mxu0 %vm1969_vm0, %v1968_v0 }
 0x35d   : > { %1657 = vmatmul.mubr.msk.bf16.vlgmr.msra.gmra.mxu0 %vm360_vm5, %v1226_v22 }
 0x398   : > { %v487_v23 = vpop.xlane.xlu1 %486 }
 0x399   : > { %1797 = vrcp.f32 %v487_v23 }
 0x3a0   : > { %v610_v24 = vpop.xlane.xlu0 %609 }
 0x3a1   : > { %1799 = vrcp.f32 %v610_v24 }
 0x3a6   : > { %v1798_v14 = vpop.eup %1797 }
 0x3ae   : > { %v1800_v35 = vpop.eup %1799 }
 0x3c5   : > { %v733_v45 = vpop.xlane.xlu0 %732 }
 0x3c8   : > { %v414_v25 = vpop.f32.mrf.mxu0 }
 0x3c9   : > { %v856_v26 = vpop.xlane.xlu1 %855 }
 0x3ca   : > { %v1574_v27 = vpop.f32.mrf.mxu0 }
 0x3cc   : > { %v417_v28 = vpop.f32.mrf.mxu0 }
 0x3cd   : > { %v1102_v29 = vpop.xlane.xlu1 %1101 }
 0x3ce   : > { %v1575_v30 = vpop.f32.mrf.mxu0 }
 0x3d0   : > { %v531_v31 = vpop.f32.mrf.mxu0 }
 0x3d1   : > { %v538_v32 = vmul.f32 %v1798_v14, %v531_v31  ;;  %v369_v15 = vpop.xlane.xlu1 %368 }
 0x3d2   : > { %1801 = vrcp.f32 %v369_v15  ;;  %v1586_v16 = vpop.f32.mrf.mxu0 }
 0x3d3   : > { %v1511_v17 = vpack.c.bf16 %v538_v32, %v538_v32  ;;  %1803 = vrcp.f32 %v733_v45  ;;  %v1503_v32 = vld [vmem:[%s2376_s3] ss:$0 sm:$0xff] }
 0x3d4   : > { %v534_v33 = vpop.f32.mrf.mxu0  ;;  %1805 = vrcp.f32 %v856_v26 }
 0x3d5   : > { %543 = vrot.lane.b32.xlu0 %v1511_v17, %s1993_s13  ;;  %v979_v47 = vpop.xlane.xlu0 %978  ;;  %s1355_s13 = scalar_lea.sflag [#allocation6], %s2144_s30 }
 0x3d6   : > { %v1587_v34 = vpop.f32.mrf.mxu0  ;;  %1807 = vrcp.f32 %v979_v47 }
 0x3d7   : > { %1809 = vrcp.f32 %v1102_v29 }
 0x3d8   : > { %v654_v36 = vpop.f32.mrf.mxu0 }
 0x3d9   : > { %v661_v37 = vmul.f32 %v1800_v35, %v654_v36  ;;  %v1225_v62 = vpop.xlane.xlu0 %1224 }
 0x3da   : > { %v1598_v38 = vpop.f32.mrf.mxu0  ;;  %1811 = vrcp.f32 %v1225_v62 }
 0x3db   : > { %v1512_v39 = vpack.c.bf16 %v661_v37, %v661_v37 }
 0x3dc   : > { %v657_v40 = vpop.f32.mrf.mxu0 }
 0x3dd   : > { %666 = vrot.lane.b32.xlu1 %v1512_v39, %s1994_s25  ;;  %s2000_s25 = smov [#allocation10]  }
 0x3de   : > { %v1599_v41 = vpop.f32.mrf.mxu0 }
 0x3df   : > { %v1802_v42 = vpop.eup %1801 }
 0x3e0   : > { %v421_v43 = vmul.f32 %v1802_v42, %v414_v25  ;;  %v1804_v46 = vpop.eup %1803 }
 0x3e1   : > { %v1806_v54 = vpop.eup %1805 }
 0x3e2   : > { %v422_v44 = vpack.c.bf16 %v421_v43, %v421_v43 }
 0x3e3   : > { %v1808_v61 = vpop.eup %1807 }
 0x3e4   : > { %424 = vst.msk [vmem:[#allocation3] sm:$0xf] %vm423_vm6, %v422_v44  ;;  %v1810_v6 = vpop.eup %1809 }
 0x3e7   : > { %v1812_v19 = vpop.eup %1811 }
 0x3fd   : > { %v777_v48 = vpop.f32.mrf.mxu0 }
 0x3fe   : > { %v784_v49 = vmul.f32 %v1804_v46, %v777_v48 }
 0x3ff   : > { %v1610_v50 = vpop.f32.mrf.mxu0 }
 0x400   : > { %v1513_v51 = vpack.c.bf16 %v784_v49, %v784_v49 }
 0x401   : > { %v780_v52 = vpop.f32.mrf.mxu0 }
 0x402   : > { %789 = vrot.lane.b32.xlu1 %v1513_v51, %s1995_s26  ;;  %s1897_s26 = sshll.u32 %s2000_s25, 4  ;;  %s1898_s26 = int_to_ptr.vmem [resolvable:$false] %s1897_s26 }
 0x403   : > { %v1611_v53 = vpop.f32.mrf.mxu0  ;;  %p1900_p6 = scmp.lt.s32.totalorder %s2331_s5, %s1898_s26 }
 0x405   : > { %v900_v55 = vpop.f32.mrf.mxu0 }
 0x406   : > { %v907_v56 = vmul.f32 %v1806_v54, %v900_v55 }
 0x407   : > { %v1622_v57 = vpop.f32.mrf.mxu0 }
 0x408   : > { %v1514_v58 = vpack.c.bf16 %v907_v56, %v907_v56 }
 0x409   : > { %v903_v59 = vpop.f32.mrf.mxu0 }
 0x40a   : > { %912 = vrot.lane.b32.xlu0 %v1514_v58, %s1996_s24  ;;  %s1899_s24 = scalar_lea.vmem %s1898_s26, 256 }
 0x40b   : > { %v1623_v60 = vpop.f32.mrf.mxu0  ;;  %p1901_p12 = scmp.lt.s32.totalorder %s1899_s24, %s1893_s19 }
 0x40d   : > { %v1023_v63 = vpop.f32.mrf.mxu0  ;;  %p1902_p7 = por %p1901_p12, %p1900_p6 }
 0x40e   : > { %v1030_v1 = vmul.f32 %v1808_v61, %v1023_v63 }
 0x40f   : > { %v1634_v2 = vpop.f32.mrf.mxu0  ;;  %p1903_p9 = pnand %p1902_p7, %p1896_p2 }
 0x410   : > { %v1515_v3 = vpack.c.bf16 %v1030_v1, %v1030_v1 }
 0x411   : > { %v1026_v4 = vpop.f32.mrf.mxu0 }
 0x412   : > { %1035 = vrot.lane.b32.xlu1 %v1515_v3, %s1997_s27 }
 0x413   : > { %v1635_v5 = vpop.f32.mrf.mxu0 }
 0x415   : > { %v1146_v7 = vpop.f32.mrf.mxu0 }
 0x416   : > { %v1153_v9 = vmul.f32 %v1810_v6, %v1146_v7 }
 0x417   : > { %v1646_v10 = vpop.f32.mrf.mxu0 }
 0x418   : > { %v1516_v12 = vpack.c.bf16 %v1153_v9, %v1153_v9 }
 0x419   : > { %v1149_v18 = vpop.f32.mrf.mxu0 }
 0x41a   : > { %1158 = vrot.lane.b32.xlu0 %v1516_v12, %s1998_s28 }
 0x41b   : > { %v1647_v13 = vpop.f32.mrf.mxu0 }
 0x41d   : > { %v1269_v20 = vpop.f32.mrf.mxu0 }
 0x41e   : > { %v1276_v21 = vmul.f32 %v1812_v19, %v1269_v20 }
 0x41f   : > { %v1658_v22 = vpop.f32.mrf.mxu0 }
 0x420   : > { %v1517_v23 = vpack.c.bf16 %v1276_v21, %v1276_v21 }
 0x421   : > { %v1272_v24 = vpop.f32.mrf.mxu0 }
 0x422   : > { %1281 = vrot.lane.b32.xlu1 %v1517_v23, %s1999_s8 }
 0x423   : > { %v1659_v25 = vpop.f32.mrf.mxu0 }
 0x447   : > { %v544_v26 = vpop.permute.xlu0 %543 }
 0x448   : > { %547 = vst.msk [vmem:[#allocation3] sm:$0xf] %vm546_vm7, %v544_v26 }
 0x44f   : > { %v667_v27 = vpop.permute.xlu1 %666 }
 0x450   : > { %670 = vst.msk [vmem:[#allocation3] sm:$0xf] %vm669_vm8, %v667_v27 }
 0x474   : > { %v790_v0 = vpop.permute.xlu1 %789 }
 0x475   : > { %793 = vst.msk [vmem:[#allocation3] sm:$0xf] %vm792_vm9, %v790_v0 }
 0x47c   : > { %v913_v28 = vpop.permute.xlu0 %912 }
 0x47d   : > { %916 = vst.msk [vmem:[#allocation3] sm:$0xf] %vm915_vm10, %v913_v28 }
 0x484   : > { %v1036_v29 = vpop.permute.xlu1 %1035 }
 0x485   : > { %1039 = vst.msk [vmem:[#allocation3] sm:$0xf] %vm1038_vm11, %v1036_v29 }
 0x48c   : > { %v1159_v30 = vpop.permute.xlu0 %1158 }
 0x48d   : > { %1162 = vst.msk [vmem:[#allocation3] sm:$0xf] %vm1161_vm12, %v1159_v30 }
 0x494   : > { %v1282_v14 = vpop.permute.xlu1 %1281 }
 0x495   : > { %1285 = vst.msk [vmem:[#allocation3] sm:$0xf] %vm1284_vm13, %v1282_v14 }
 0x49c   : > { %v1286_v31 = vld [vmem:[#allocation3] sm:$0xf] }
 0x49d   : > { %1665 = vmatmul.mubr.msk.bf16.vlgmr.msra.gmra.mxu1 %vm260_vm1, %v1286_v31 }
 0x55d   : > { %v1347_v15 = vpop.f32.mrf.mxu1 }
 0x55e   : > { %v1348_v16 = vadd.f32 %v1503_v32, %v1347_v15 }
 0x55f   : > { %v1666_v17 = vpop.f32.mrf.mxu1 }
 0x560   : > { %1353 = vst.msk [vmem:[%s241_s29] sm:$0xff] %vm260_vm1, %v1348_v16 }
 0x561   : > { %v1350_v33 = vpop.f32.mrf.mxu1 }
 0x562   : > { %1906 = shalt.err (!%p1903_p9)
}
 0x563   : > { %s1907_s27 = scalar_lea.hbm %s2329_s12, 128  ;;  %s1911_s8 = scalar_lea.hbm %s2377_s4, 256 }
 0x564   : > { %p1908_p13 = scmp.ne.s32.totalorder %s2329_s12, %s1907_s27  ;;  %p1912_p0 = scmp.lt.s32.totalorder %s2329_s12, %s2377_s4 }
 0x565   : > { %p1913_p4 = scmp.lt.s32.totalorder %s1911_s8, %s1907_s27 }
 0x566   : > { %p1909_p5 = pnand %p1908_p13, %p2393_p11 }
 0x567   : > { %p1914_p8 = por %p1913_p4, %p1912_p0 }
 0x568   : > { %p1910_p10 = pneg %p1909_p5 }
 0x56a   : > { %p1915_p3 = pnand %p1914_p8, %p1910_p10 }
 0x56c   : > { %1918 = shalt.err (!%p1915_p3)
}
 0x56d   : > { %1678 = dma.vmem_to_hbm [thread:$0]  (%p2393_p11), %s2331_s5, 128, %s2329_s12, %s1355_s13   ;;  %v1667_v34 = vpop.f32.mrf.mxu1 }
 0x56e PF: > { %s1380_s21 = sand.u32 1, %s1949_s15   ;;  %p2394_p1 = scmp.ne.s32.totalorder %s2383_s22, 0 }
 0x56f   : > { %p2395_p2 = scmp.ge.s32.totalorder %s1961_s18, 2  ;;  %s1381_s23 = scalar_lea.sflag [#allocation6], %s1380_s21 }
 0x571   : > { %p1692_p6 = pnand %p2395_p2, %p2394_p1 }
 0x573   : > { %p1693_p12 = pneg %p1692_p6 }
 0x575   : > { %1944 = dma.done.wait (%p1693_p12), %s1381_s23, 128  }
 0x576   : > { %1946 = vsyncadd (%p1693_p12), %s1381_s23, 4294967168  ;;  %p18_p7 = scmp.ge.s32.totalorder %s2098_s11, 4   ;;  %s2396_s15 = smov %s1953_s16 }
 0x577   : > { %s2397_s16 = smov %s1957_s17  ;;  %s2398_s17 = smov %s2114_s20 }
 0x578   : > { %s2399_s18 = smov %s2098_s11  ;;  %20 = sbr.rel (!%p18_p7) target bundleno = 6 (0x6), region = 89 }
 0x57d   :  { %1386 = vsyncpa [#allocation5], 1 }
 0x57e   :  { %1388 = vsyncpa [#allocation5 + $0x1], 1 }
 0x57f   :  { %1389 = vsyncpa [#allocation8], 1 }
 0x580   :  { %1390 = vsyncpa [#allocation6], 1 }
 0x581   :  { %1392 = vsyncpa [#allocation6 + $0x1], 1 }

</bundles_post_ra>
